<compile_context>
chip_gen: v6e
topology: v6e:2x2x1
jax: 0.10.0
libtpu: 0.0.40
codegen_flags: <defaults>
</compile_context>

<pallas_src>
import functools

import jax
import jax.numpy as jnp
from jax.experimental import pallas as pl
from jax.experimental.pallas import tpu as pltpu


# --------------------- Pallas kernel: tiled Gram accumulation --------------------- #

def _tensorcores_per_chip():
    """2 on v7x (two TensorCores per chip), else 1 (v5e / v6e are single-TC)."""
    try:
        kind = jax.devices()[0].device_kind.lower()
    except Exception:  # pragma: no cover - defensive
        return 1
    return 2 if "v7" in kind else 1


def _plan_tiles(num, d, num_cores, *, td_target=65536, input_budget_bytes=8 << 20):
    """Lane-dense tile plan over the feature dim D (f32 streaming).

    TD is a multiple of 128, capped so the double-buffered (num, TD) f32 input
    stays under `input_budget_bytes` (safe inside the default scoped VMEM on all
    of v5e / v6e / v7x), and never larger than needed to cover D per core.
    """
    bytes_per_col = num * 4                                   # one f32 feature column
    td_cap = max(128, (input_budget_bytes // (2 * bytes_per_col)) // 128 * 128)
    d_per_core = pl.cdiv(d, num_cores)
    td_need = ((d_per_core + 127) // 128) * 128
    td = max(128, min(td_target, td_cap, td_need))
    n_tiles = pl.cdiv(d, td)                                  # tiles actually covering D
    n_k = pl.cdiv(n_tiles, num_cores)                         # reduction steps per core
    return td, n_k, n_tiles


def _gram_kernel(f_ref, gram_ref, *, d_total, td, n_k, needs_mask):
    """Accumulate a partial f32 Gram matrix over lane-dense feature tiles.

    f_ref:    (num, TD)     f32 feature tile
    gram_ref: (1, num, num) f32 partial Gram for this core slice (resident across k)
    """
    c = pl.program_id(0)
    k = pl.program_id(1)

    @pl.when(k == 0)
    def _():
        gram_ref[...] = jnp.zeros_like(gram_ref)

    f = f_ref[...]                                            # (num, TD) f32
    if needs_mask:
        # Pallas does not zero OOB block reads: mask tail / fully-OOB tiles.
        start = (c * n_k + k) * td
        col = jax.lax.broadcasted_iota(jnp.int32, f.shape, 1) + start
        f = jnp.where(col < d_total, f, jnp.float32(0.0))

    # Contract last dims directly (transposed-RHS matmul; no explicit f.T through
    # the XLU).  Full-f32 MXU accumulation; there is huge MXU slack at num ~ 4-32.
    g = jax.lax.dot_general(
        f, f,
        dimension_numbers=(((1,), (1,)), ((), ())),
        preferred_element_type=jnp.float32,
        precision=jax.lax.Precision.HIGHEST)                  # (num, num) f32
    gram_ref[...] += g[None]


def feature_gram(f_f32, *, num_cores=None, td_target=65536):
    """(num_cores, num, num) partial Gram sums of per-particle flattened features."""
    num, d = f_f32.shape
    if num_cores is None:
        num_cores = _tensorcores_per_chip()
    td, n_k, n_tiles = _plan_tiles(num, d, num_cores, td_target=td_target)
    needs_mask = (num_cores * n_k * td) != d

    if num_cores * n_k > n_tiles:
        # Extra (fully out-of-range) tiles on the last core: clamp the DMA to a
        # valid block; the in-kernel mask zeroes its contribution exactly.
        def in_map(c, k):
            return (0, jnp.minimum(c * n_k + k, n_tiles - 1))
    else:
        def in_map(c, k):
            return (0, c * n_k + k)

    core_sem = (getattr(pltpu, "CORE_PARALLEL", "parallel")
                if num_cores > 1 else "arbitrary")

    kernel = functools.partial(
        _gram_kernel, d_total=d, td=td, n_k=n_k, needs_mask=needs_mask)

    return pl.pallas_call(
        kernel,
        out_shape=jax.ShapeDtypeStruct((num_cores, num, num), jnp.float32),
        grid=(num_cores, n_k),
        in_specs=[pl.BlockSpec((num, td), in_map)],
        out_specs=pl.BlockSpec((1, num, num), lambda c, k: (c, 0, 0)),
        compiler_params=pltpu.CompilerParams(
            dimension_semantics=(core_sem, "arbitrary")),
        cost_estimate=pl.CostEstimate(
            flops=2 * num * num * d,
            transcendentals=0,
            bytes_accessed=num * d * 4 + num_cores * num * num * 4),
    )(f_f32)


def rbf_repulsion(f_flat):
    """RBF (median-heuristic) pairwise repulsion over per-particle features."""
    num = f_flat.shape[0]
    gram_parts = feature_gram(f_flat)

    # Tiny O(num^2) epilogue in jnp (combines per-core partials on v7x).
    gram = jnp.sum(gram_parts, axis=0)                        # (num, num) f32
    sq = jnp.diagonal(gram)[:, None]                          # squared norms == diag(gram)
    dist2 = jnp.maximum(sq + sq.T - 2.0 * gram, 0.0)
    offdiag = 1.0 - jnp.eye(num, dtype=jnp.float32)
    dist2 = dist2 * offdiag                                   # exact-zero diagonal
    # Median-heuristic bandwidth (SVGD / HE style).
    # TODO(synk): median is over the full num x num matrix (incl. zero diagonal);
    # verify against the exact ModelLayersKernel bandwidth definition.
    h = jnp.median(dist2) / jnp.log(jnp.float32(num) + 1.0)
    h = jnp.maximum(h, jnp.float32(1e-8))
    k_mat = jnp.exp(-dist2 / h)
    denom = float(num * (num - 1)) if num > 1 else 1.0
    rep_loss = jnp.sum(k_mat * offdiag) / denom               # mean off-diagonal energy
    return k_mat, rep_loss


# --------------------------- module forward (glue) --------------------------- #

def repulsive_kernel_forward(params, feats_ind, pred_ind, gt, *,
                             beta_ind, gamma, l2_reg=None,
                             warmup=0, step=0, training=True):
    """Forward pass of RepulsiveKernel (in-distribution path; ood_loss=None)."""
    num = pred_ind.shape[0]
    track = {}

    # ---- ParticleMethods.forward: ind_loss and beta scaling ----
    pred = pred_ind.astype(jnp.float32).reshape(num, -1)
    gt_f = gt.astype(jnp.float32).reshape(1, -1)
    ind_loss = jnp.mean(jnp.square(pred - gt_f))              # tiny -> plain jnp, XLA fuses
    track["ind_loss"] = ind_loss
    loss = jnp.abs(beta_ind) * ind_loss

    # ---- ParticleMethods.forward: optional L2 regularization over params ----
    if l2_reg is not None:
        l2_total = jnp.float32(0.0)
        for pname, pvalue in params.items():
            if "affine" in pname or "bias" in pname or "skip" in pname:
                continue
            pf = pvalue.astype(jnp.float32).reshape(pvalue.shape[0], -1)
            l2_total = l2_total + jnp.mean(jnp.mean(jnp.square(pf), axis=1))
        loss = loss + (l2_reg / 2.0) * l2_total

    # ---- RepulsiveKernel.forward: warmup coefficient ----
    if training and warmup is not None and step is not None and step < warmup:
        warmup_coeff = (1e-08 + step) / warmup
    else:
        warmup_coeff = 1.0

    # ---- RepulsiveKernel.forward: feature-repulsion kernel (Pallas) ----
    # Stream f32 features directly from HBM (no extra cast/pad round-trips).
    f_flat = feats_ind.astype(jnp.float32).reshape(num, -1)
    k_mat, rep_loss = rbf_repulsion(f_flat)
    track["ind_kernel"] = k_mat
    track["ind_rep_loss"] = rep_loss
    rep_loss_safe = jnp.where(jnp.isnan(rep_loss), jnp.float32(0.0), rep_loss)
    loss = loss + warmup_coeff * jnp.abs(gamma) * rep_loss_safe

    track["loss"] = loss
    return track


# ----------------------------------- main ------------------------------------ #

if __name__ == "__main__":
    key = jax.random.PRNGKey(0)
    num = 4          # number of particles
    B, C, H, W = 2, 4, 16, 16
    n_out = 8

    k_x, k_feat, k_pred, k_gt, k_w, k_b, k_a = jax.random.split(key, 7)

    # Inputs / tracked tensors (x itself is unused by the MSE ind_loss, kept for parity).
    x = jax.random.normal(k_x, (B, C, H, W), jnp.float32)                  # NCHW input
    feats_ind = jax.random.normal(k_feat, (num, B, C, H, W), jnp.float32)  # per-particle feats
    pred_ind = jax.random.normal(k_pred, (num, B, n_out), jnp.float32)     # per-particle preds
    gt = jax.random.normal(k_gt, (B, n_out), jnp.float32)                  # shared ground truth

    # Batched particle parameters (deterministic init); bias/affine get skipped by l2.
    params = {
        "layer0.conv.weight": jax.random.normal(k_w, (num, C, C, 3, 3), jnp.float32) * 0.1,
        "layer0.conv.bias": jax.random.normal(k_b, (num, C), jnp.float32) * 0.1,
        "layer0.affine.weight": jax.random.normal(k_a, (num, C), jnp.float32) * 0.1,
    }

    # Module parameters (deterministic, matching __init__ defaults).
    beta_ind = jnp.float32(1.0)
    gamma = jnp.float32(1.0)
    l2_reg = 0.01
    warmup = 0
    step = 0

    fwd = jax.jit(functools.partial(
        repulsive_kernel_forward,
        beta_ind=beta_ind, gamma=gamma, l2_reg=l2_reg,
        warmup=warmup, step=step, training=True,
    ))
    track = fwd(params, feats_ind, pred_ind, gt)
    jax.block_until_ready(track["loss"])
    jax.block_until_ready(track["ind_kernel"])
    assert track["ind_kernel"].shape == (num, num)
    assert track["loss"].shape == ()
    assert not bool(jnp.isnan(track["loss"]))
    print("KERNEL_OK")
</pallas_src>

<mosaic_0001>
module attributes {stable_mosaic.version = 11 : i64} {
  func.func @_gram_kernel(%arg0: i32, %arg1: i32, %arg2: memref<4x2048xf32, #tpu.memory_space<vmem>>, %arg3: memref<1x4x4xf32, #tpu.memory_space<vmem>>) attributes {dimension_semantics = [#tpu.dimension_semantics<arbitrary>, #tpu.dimension_semantics<arbitrary>], iteration_bounds = array<i64: 1, 1>, scalar_prefetch = 0 : i64, scratch_operands = 0 : i64, tpu.core_type = #tpu.core_type<tc>, window_params = [{transform_indices = @transform_0, window_bounds = array<i64: 4, 2048>}, {transform_indices = @transform_1, window_bounds = array<i64: 1, 4, 4>}]} {
    %c0_i32 = arith.constant 0 : i32
    %0 = arith.cmpi eq, %arg1, %c0_i32 : i32
    %1 = arith.extui %0 : i1 to i32
    %c0_i32_0 = arith.constant 0 : i32
    %2 = arith.cmpi ne, %1, %c0_i32_0 : i32
    scf.if %2 {
      %cst_8 = arith.constant 0.000000e+00 : f32
      %9 = vector.broadcast %cst_8 : f32 to vector<1x4x4xf32>
      %c0_9 = arith.constant 0 : index
      %c0_10 = arith.constant 0 : index
      %c0_11 = arith.constant 0 : index
      %10 = vector.load %arg3[%c0_9, %c0_10, %c0_11] : memref<1x4x4xf32, #tpu.memory_space<vmem>>, vector<1x4x4xf32>
      tpu.vector_store %arg3[%c0_9, %c0_10, %c0_11], %9 {strides = array<i32>} : memref<1x4x4xf32, #tpu.memory_space<vmem>>, vector<1x4x4xf32>,
    } else {
    }
    %c0 = arith.constant 0 : index
    %c0_1 = arith.constant 0 : index
    %3 = vector.load %arg2[%c0, %c0_1] : memref<4x2048xf32, #tpu.memory_space<vmem>>, vector<4x2048xf32>
    %cst = arith.constant dense<0.000000e+00> : vector<4x4xf32>
    %4 = tpu.matmul %3, %3, %cst {dimension_numbers = #tpu.dot_dimension_numbers<[1], [1], [0], [0], [0, 0, 1, 0], [], []>, precision = #tpu.contract_precision<fp32>} : vector<4x2048xf32>, vector<4x2048xf32>, vector<4x4xf32> -> vector<4x4xf32>
    %c0_2 = arith.constant 0 : index
    %c0_3 = arith.constant 0 : index
    %c0_4 = arith.constant 0 : index
    %5 = vector.load %arg3[%c0_2, %c0_3, %c0_4] : memref<1x4x4xf32, #tpu.memory_space<vmem>>, vector<1x4x4xf32>
    %6 = vector.shape_cast %4 : vector<4x4xf32> to vector<1x4x4xf32>
    %7 = arith.addf %5, %6 : vector<1x4x4xf32>
    %c0_5 = arith.constant 0 : index
    %c0_6 = arith.constant 0 : index
    %c0_7 = arith.constant 0 : index
    %8 = vector.load %arg3[%c0_5, %c0_6, %c0_7] : memref<1x4x4xf32, #tpu.memory_space<vmem>>, vector<1x4x4xf32>
    tpu.vector_store %arg3[%c0_5, %c0_6, %c0_7], %7 {strides = array<i32>} : memref<1x4x4xf32, #tpu.memory_space<vmem>>, vector<1x4x4xf32>,
    return
  }
  func.func @transform_0(%arg0: i32, %arg1: i32) -> (i32, i32) {
    %c1_i32 = arith.constant 1 : i32
    %0 = arith.muli %arg0, %c1_i32 : i32
    %1 = arith.addi %0, %arg1 : i32
    %c0_i32 = arith.constant 0 : i32
    %c0_i32_0 = arith.constant 0 : i32
    return %c0_i32, %1 : i32, i32
  }
  func.func @transform_1(%arg0: i32, %arg1: i32) -> (i32, i32, i32) {
    %c0_i32 = arith.constant 0 : i32
    %c0_i32_0 = arith.constant 0 : i32
    %c0_i32_1 = arith.constant 0 : i32
    return %arg0, %c0_i32, %c0_i32_0 : i32, i32, i32
  }
}

</mosaic_0001>

<bundles_post_ra>
// kernel: repulsive_kernel_forward.1
= control target key start
LH: loop header
LB: loop body
LE: loop exit
PB: predicated region body
PF: predicated region fallthrough
CT: control target
= control target key end

     0   :  { %vm34_vm0 = vcmask 27648   ;;  %s4039_s0 = inlined_call_operand.vmem [shape: f32[4,2048], index: 0, kind: input, shape index: {}]   ;;  %s4040_s1 = inlined_call_operand.vmem [shape: f32[1,4,4], index: 1, kind: output, shape index: {}]  }
   0x1   :  { %v36_v0 = vld [vmem:[%s4039_s0] sm:$0xff]  ;;  %v37_v1 = vld [vmem:[%s4039_s0 + $0x8] sm:$0xff]  ;;  %v38_v15 = vld [vmem:[%s4039_s0 + $0x10] sm:$0xff] }
   0x2   :  { %v52_v2 = vcombine.high %v36_v0, %v36_v0  ;;  %v100_v3 = vand.u32 4294901760, %v36_v0  ;;  %v53_v4 = vcombine.high %v37_v1, %v37_v1  ;;  %v3886_v10 = vand.u32 4294901760, %v37_v1  ;;  %v39_v28 = vld [vmem:[%s4039_s0 + $0x18] sm:$0xff]  ;;  %v40_v40 = vld [vmem:[%s4039_s0 + $0x20] sm:$0xff]  ;;  %v41_v52 = vld [vmem:[%s4039_s0 + $0x28] sm:$0xff] }
   0x3   :  { %v54_v20 = vcombine.high %v38_v15, %v38_v15  ;;  %v3895_v25 = vand.u32 4294901760, %v38_v15  ;;  %v55_v32 = vcombine.high %v39_v28, %v39_v28  ;;  %v3910_v37 = vand.u32 4294901760, %v39_v28 }
   0x4   :  { %v98_v5 = vand.u32 4294901760, %v52_v2  ;;  %v141_v6 = vsub.f32 %v36_v0, %v100_v3  ;;  %v3884_v7 = vand.u32 4294901760, %v53_v4  ;;  %v613_v17 = vsub.f32 %v37_v1, %v3886_v10  ;;  %v42_v0 = vld [vmem:[%s4039_s0 + $0x30] sm:$0xff] }
   0x5   :  { %v3893_v23 = vand.u32 4294901760, %v54_v20  ;;  %v1085_v30 = vsub.f32 %v38_v15, %v3895_v25  ;;  %v3906_v35 = vand.u32 4294901760, %v55_v32  ;;  %v1557_v42 = vsub.f32 %v39_v28, %v3910_v37 }
   0x6   :  { %99 = vmatprep.subr.mxu0 %v98_v5  ;;  %v135_v8 = vsub.f32 %v52_v2, %v98_v5  ;;  %v142_v9 = vand.u32 4294901760, %v141_v6  ;;  %225 = vmatprep.mubr.f32.mxu1 %v98_v5  ;;  %v607_v13 = vsub.f32 %v53_v4, %v3884_v7  ;;  %v614_v21 = vand.u32 4294901760, %v613_v17 }
   0x7   :  { %101 = vmatpush1.xpose.msra.mxu0 %v100_v3  ;;  %v1079_v27 = vsub.f32 %v54_v20, %v3893_v23  ;;  %v1086_v33 = vand.u32 4294901760, %v1085_v30  ;;  %v1551_v39 = vsub.f32 %v55_v32, %v3906_v35  ;;  %v56_v44 = vcombine.high %v40_v40, %v40_v40 }
   0x8   :  { %v136_v11 = vand.u32 4294901760, %v135_v8  ;;  %v143_v12 = vsub.f32 %v141_v6, %v142_v9  ;;  %264 = vmatprep.subr.mxu0 %v135_v8  ;;  %v608_v19 = vand.u32 4294901760, %v607_v13  ;;  %v615_v24 = vsub.f32 %v613_v17, %v614_v21 }
   0x9   :  { %v1080_v31 = vand.u32 4294901760, %v1079_v27  ;;  %v1087_v36 = vsub.f32 %v1085_v30, %v1086_v33  ;;  %v1552_v43 = vand.u32 4294901760, %v1551_v39  ;;  %v1558_v45 = vand.u32 4294901760, %v1557_v42 }
   0xa   :  { %v137_v14 = vsub.f32 %v135_v8, %v136_v11  ;;  %v144_v16 = vand.u32 4294901760, %v143_v12  ;;  %v609_v22 = vsub.f32 %v607_v13, %v608_v19  ;;  %v616_v29 = vand.u32 4294901760, %v615_v24  ;;  %v43_v12 = vld [vmem:[%s4039_s0 + $0x38] sm:$0xff] }
   0xb   :  { %v1081_v34 = vsub.f32 %v1079_v27, %v1080_v31  ;;  %v1088_v41 = vand.u32 4294901760, %v1087_v36  ;;  %v1553_v46 = vsub.f32 %v1551_v39, %v1552_v43  ;;  %v3927_v47 = vand.u32 4294901760, %v56_v44 }
   0xc   :  { %v138_v18 = vand.u32 4294901760, %v137_v14  ;;  %v610_v26 = vand.u32 4294901760, %v609_v22  ;;  %v1559_v48 = vsub.f32 %v1557_v42, %v1558_v45  ;;  %v3931_v49 = vand.u32 4294901760, %v40_v40 }
   0xd   :  { %v1082_v38 = vand.u32 4294901760, %v1081_v34  ;;  %v1554_v50 = vand.u32 4294901760, %v1553_v46  ;;  %v2023_v51 = vsub.f32 %v56_v44, %v3927_v47  ;;  %v57_v56 = vcombine.high %v41_v52, %v41_v52 }
   0xe   :  { %139 = vmatprep.mubr.f32.mxu0 %v138_v18  ;;  %185 = vmatprep.subr.mxu1 %v138_v18  ;;  %v1560_v53 = vand.u32 4294901760, %v1559_v48  ;;  %v2029_v54 = vsub.f32 %v40_v40, %v3931_v49  ;;  %v3952_v61 = vand.u32 4294901760, %v41_v52  ;;  %v58_v4 = vcombine.high %v42_v0, %v42_v0 }
   0xf   :  { %145 = vmatmul.mubr.f32.vlgmr.msra.gmra.mxu0 %v144_v16  ;;  %191 = vmatpush1.xpose.msra.mxu1 %v144_v16  ;;  %v2024_v55 = vand.u32 4294901760, %v2023_v51  ;;  %v3948_v59 = vand.u32 4294901760, %v57_v56  ;;  %v59_v16 = vcombine.high %v43_v12, %v43_v12  ;;  %v3867_v32 = vmov 0.0  }
  0x10   :  { %267 = vmatpush1.xpose.msra.mxu0 %v141_v6  ;;  %302 = vmatprep.mubr.f32.mxu0 %v135_v8  ;;  %v2030_v57 = vand.u32 4294901760, %v2029_v54  ;;  %v2501_v2 = vsub.f32 %v41_v52, %v3952_v61  ;;  %35 = vst.msk [vmem:[%s4040_s1] sm:$0xf] %vm34_vm0, %v3867_v32 }
  0x11   :  { %341 = vmatprep.subr.mxu1 %v98_v5  ;;  %421 = vmatprep.subr.mxu0 %v136_v11  ;;  %v2025_v58 = vsub.f32 %v2023_v51, %v2024_v55  ;;  %v2495_v63 = vsub.f32 %v57_v56, %v3948_v59 }
  0x12   :  { %227 = vmatmul.mubr.f32.vlgmr.msra.gmra.mxu1 %v100_v3  ;;  %v2031_v60 = vsub.f32 %v2029_v54, %v2030_v57 }
  0x13   :  { %305 = vmatmul.mubr.f32.vlgmr.msra.gmra.mxu0 %v141_v6  ;;  %343 = vmatpush1.xpose.msra.mxu1 %v100_v3  ;;  %v2026_v62 = vand.u32 4294901760, %v2025_v58 }
  0x14   :  { %425 = vmatpush1.xpose.msra.mxu0 %v142_v9  ;;  %379 = vmatprep.mubr.f32.mxu1 %v136_v11  ;;  %v2032_v1 = vand.u32 4294901760, %v2031_v60 }
  0x15   :  { %459 = vmatprep.mubr.f32.mxu0 %v98_v5  ;;  %497 = vmatprep.subr.mxu1 %v98_v5 }
  0x16   :  { %383 = vmatmul.mubr.f32.vlgmr.msra.gmra.mxu1 %v142_v9  ;;  %571 = vmatprep.subr.mxu0 %v3884_v7  ;;  %v3973_v9 = vand.u32 4294901760, %v42_v0 }
  0x17   :  { %461 = vmatmul.mubr.f32.vlgmr.msra.gmra.mxu0 %v100_v3  ;;  %499 = vmatpush1.xpose.msra.mxu1 %v100_v3 }
  0x18   :  { %573 = vmatpush1.xpose.msra.mxu0 %v3886_v10  ;;  %533 = vmatprep.mubr.f32.mxu1 %v98_v5  ;;  %v2502_v5 = vand.u32 4294901760, %v2501_v2  ;;  %v2973_v14 = vsub.f32 %v42_v0, %v3973_v9 }
  0x19   :  { %611 = vmatprep.mubr.f32.mxu0 %v610_v26  ;;  %657 = vmatprep.subr.mxu1 %v610_v26 }
  0x1a   :  { %535 = vmatmul.mubr.f32.vlgmr.msra.gmra.mxu1 %v100_v3  ;;  %736 = vmatprep.subr.mxu0 %v607_v13  ;;  %v2496_v3 = vand.u32 4294901760, %v2495_v63  ;;  %v2503_v8 = vsub.f32 %v2501_v2, %v2502_v5 }
  0x1b   :  { %617 = vmatmul.mubr.f32.vlgmr.msra.gmra.mxu0 %v616_v29  ;;  %663 = vmatpush1.xpose.msra.mxu1 %v616_v29 }
  0x1c   :  { %739 = vmatpush1.xpose.msra.mxu0 %v613_v17  ;;  %697 = vmatprep.mubr.f32.mxu1 %v3884_v7  ;;  %v2497_v6 = vsub.f32 %v2495_v63, %v2496_v3 }
  0x1d   :  { %774 = vmatprep.mubr.f32.mxu0 %v607_v13  ;;  %813 = vmatprep.subr.mxu1 %v3884_v7  ;;  %v2504_v13 = vand.u32 4294901760, %v2503_v8 }
  0x1e   :  { %699 = vmatmul.mubr.f32.vlgmr.msra.gmra.mxu1 %v3886_v10  ;;  %893 = vmatprep.subr.mxu0 %v608_v19 }
  0x1f   :  { %777 = vmatmul.mubr.f32.vlgmr.msra.gmra.mxu0 %v613_v17  ;;  %815 = vmatpush1.xpose.msra.mxu1 %v3886_v10  ;;  %v2974_v17 = vand.u32 4294901760, %v2973_v14 }
  0x20   :  { %897 = vmatpush1.xpose.msra.mxu0 %v614_v21  ;;  %851 = vmatprep.mubr.f32.mxu1 %v608_v19  ;;  %v3990_v19 = vand.u32 4294901760, %v59_v16 }
  0x21   :  { %931 = vmatprep.mubr.f32.mxu0 %v3884_v7  ;;  %969 = vmatprep.subr.mxu1 %v3884_v7  ;;  %v2975_v20 = vsub.f32 %v2973_v14, %v2974_v17 }
  0x22   :  { %855 = vmatmul.mubr.f32.vlgmr.msra.gmra.mxu1 %v614_v21  ;;  %1043 = vmatprep.subr.mxu0 %v3893_v23  ;;  %v3994_v21 = vand.u32 4294901760, %v43_v12 }
  0x23   :  { %933 = vmatmul.mubr.f32.vlgmr.msra.gmra.mxu0 %v3886_v10  ;;  %971 = vmatpush1.xpose.msra.mxu1 %v3886_v10  ;;  %v2976_v24 = vand.u32 4294901760, %v2975_v20 }
  0x24   :  { %1045 = vmatpush1.xpose.msra.mxu0 %v3895_v25  ;;  %1005 = vmatprep.mubr.f32.mxu1 %v3884_v7  ;;  %v3969_v7 = vand.u32 4294901760, %v58_v4 }
  0x25   :  { %1083 = vmatprep.mubr.f32.mxu0 %v1082_v38  ;;  %1129 = vmatprep.subr.mxu1 %v1082_v38 }
  0x26   :  { %1007 = vmatmul.mubr.f32.vlgmr.msra.gmra.mxu1 %v3886_v10  ;;  %1208 = vmatprep.subr.mxu0 %v1079_v27  ;;  %v2498_v10 = vand.u32 4294901760, %v2497_v6  ;;  %v2967_v11 = vsub.f32 %v58_v4, %v3969_v7 }
  0x27   :  { %1089 = vmatmul.mubr.f32.vlgmr.msra.gmra.mxu0 %v1088_v41  ;;  %1135 = vmatpush1.xpose.msra.mxu1 %v1088_v41 }
  0x28   :  { %1211 = vmatpush1.xpose.msra.mxu0 %v1085_v30  ;;  %1169 = vmatprep.mubr.f32.mxu1 %v3893_v23  ;;  %v2968_v15 = vand.u32 4294901760, %v2967_v11 }
  0x29   :  { %1246 = vmatprep.mubr.f32.mxu0 %v1079_v27  ;;  %1285 = vmatprep.subr.mxu1 %v3893_v23 }
  0x2a   :  { %1171 = vmatmul.mubr.f32.vlgmr.msra.gmra.mxu1 %v3895_v25  ;;  %1365 = vmatprep.subr.mxu0 %v1080_v31  ;;  %v2969_v18 = vsub.f32 %v2967_v11, %v2968_v15 }
  0x2b   :  { %1249 = vmatmul.mubr.f32.vlgmr.msra.gmra.mxu0 %v1085_v30  ;;  %1287 = vmatpush1.xpose.msra.mxu1 %v3895_v25 }
  0x2c   :  { %1369 = vmatpush1.xpose.msra.mxu0 %v1086_v33  ;;  %1323 = vmatprep.mubr.f32.mxu1 %v1080_v31  ;;  %v2970_v22 = vand.u32 4294901760, %v2969_v18 }
  0x2d   :  { %1403 = vmatprep.mubr.f32.mxu0 %v3893_v23  ;;  %1441 = vmatprep.subr.mxu1 %v3893_v23 }
  0x2e   :  { %1327 = vmatmul.mubr.f32.vlgmr.msra.gmra.mxu1 %v1086_v33  ;;  %1515 = vmatprep.subr.mxu0 %v3906_v35 }
  0x2f   :  { %1405 = vmatmul.mubr.f32.vlgmr.msra.gmra.mxu0 %v3895_v25  ;;  %1443 = vmatpush1.xpose.msra.mxu1 %v3895_v25 }
  0x30   :  { %1517 = vmatpush1.xpose.msra.mxu0 %v3910_v37  ;;  %1477 = vmatprep.mubr.f32.mxu1 %v3893_v23  ;;  %v3439_v23 = vsub.f32 %v59_v16, %v3990_v19 }
  0x31   :  { %1555 = vmatprep.mubr.f32.mxu0 %v1554_v50  ;;  %1601 = vmatprep.subr.mxu1 %v1554_v50 }
  0x32   :  { %1479 = vmatmul.mubr.f32.vlgmr.msra.gmra.mxu1 %v3895_v25  ;;  %1680 = vmatprep.subr.mxu0 %v1551_v39  ;;  %v3445_v25 = vsub.f32 %v43_v12, %v3994_v21  ;;  %v3440_v26 = vand.u32 4294901760, %v3439_v23 }
  0x33   :  { %1561 = vmatmul.mubr.f32.vlgmr.msra.gmra.mxu0 %v1560_v53  ;;  %1607 = vmatpush1.xpose.msra.mxu1 %v1560_v53 }
  0x34   :  { %1683 = vmatpush1.xpose.msra.mxu0 %v1557_v42  ;;  %1641 = vmatprep.mubr.f32.mxu1 %v3906_v35  ;;  %v3446_v27 = vand.u32 4294901760, %v3445_v25  ;;  %v3441_v28 = vsub.f32 %v3439_v23, %v3440_v26 }
  0x35   :  { %1718 = vmatprep.mubr.f32.mxu0 %v1551_v39  ;;  %1757 = vmatprep.subr.mxu1 %v3906_v35 }
  0x36   :  { %1643 = vmatmul.mubr.f32.vlgmr.msra.gmra.mxu1 %v3910_v37  ;;  %1837 = vmatprep.subr.mxu0 %v1552_v43  ;;  %v3447_v29 = vsub.f32 %v3445_v25, %v3446_v27  ;;  %v3442_v30 = vand.u32 4294901760, %v3441_v28 }
  0x37   :  { %1721 = vmatmul.mubr.f32.vlgmr.msra.gmra.mxu0 %v1557_v42  ;;  %1759 = vmatpush1.xpose.msra.mxu1 %v3910_v37 }
  0x38   :  { %1841 = vmatpush1.xpose.msra.mxu0 %v1558_v45  ;;  %1795 = vmatprep.mubr.f32.mxu1 %v1552_v43  ;;  %v3448_v31 = vand.u32 4294901760, %v3447_v29 }
  0x39   :  { %1875 = vmatprep.mubr.f32.mxu0 %v3906_v35  ;;  %1913 = vmatprep.subr.mxu1 %v3906_v35 }
  0x3a   :  { %1799 = vmatmul.mubr.f32.vlgmr.msra.gmra.mxu1 %v1558_v45  ;;  %1987 = vmatprep.subr.mxu0 %v3927_v47 }
  0x3b   :  { %1877 = vmatmul.mubr.f32.vlgmr.msra.gmra.mxu0 %v3910_v37  ;;  %1915 = vmatpush1.xpose.msra.mxu1 %v3910_v37 }
  0x3c   :  { %1989 = vmatpush1.xpose.msra.mxu0 %v3931_v49  ;;  %1949 = vmatprep.mubr.f32.mxu1 %v3906_v35 }
  0x3d   :  { %2027 = vmatprep.mubr.f32.mxu0 %v2026_v62  ;;  %2073 = vmatprep.subr.mxu1 %v2026_v62 }
  0x3e   :  { %1951 = vmatmul.mubr.f32.vlgmr.msra.gmra.mxu1 %v3910_v37  ;;  %2152 = vmatprep.subr.mxu0 %v2023_v51 }
  0x3f   :  { %2033 = vmatmul.mubr.f32.vlgmr.msra.gmra.mxu0 %v2032_v1  ;;  %2079 = vmatpush1.xpose.msra.mxu1 %v2032_v1 }
  0x40   :  { %2155 = vmatpush1.xpose.msra.mxu0 %v2029_v54  ;;  %2113 = vmatprep.mubr.f32.mxu1 %v3927_v47 }
  0x41   :  { %2190 = vmatprep.mubr.f32.mxu0 %v2023_v51  ;;  %2229 = vmatprep.subr.mxu1 %v3927_v47 }
  0x42   :  { %2115 = vmatmul.mubr.f32.vlgmr.msra.gmra.mxu1 %v3931_v49  ;;  %2309 = vmatprep.subr.mxu0 %v2024_v55 }
  0x43   :  { %2193 = vmatmul.mubr.f32.vlgmr.msra.gmra.mxu0 %v2029_v54  ;;  %2231 = vmatpush1.xpose.msra.mxu1 %v3931_v49 }
  0x44   :  { %2313 = vmatpush1.xpose.msra.mxu0 %v2030_v57  ;;  %2267 = vmatprep.mubr.f32.mxu1 %v2024_v55 }
  0x45   :  { %2347 = vmatprep.mubr.f32.mxu0 %v3927_v47  ;;  %2385 = vmatprep.subr.mxu1 %v3927_v47 }
  0x46   :  { %2271 = vmatmul.mubr.f32.vlgmr.msra.gmra.mxu1 %v2030_v57  ;;  %2459 = vmatprep.subr.mxu0 %v3948_v59 }
  0x47   :  { %2349 = vmatmul.mubr.f32.vlgmr.msra.gmra.mxu0 %v3931_v49  ;;  %2387 = vmatpush1.xpose.msra.mxu1 %v3931_v49 }
  0x48   :  { %2461 = vmatpush1.xpose.msra.mxu0 %v3952_v61  ;;  %2421 = vmatprep.mubr.f32.mxu1 %v3927_v47 }
  0x49   :  { %2499 = vmatprep.mubr.f32.mxu0 %v2498_v10  ;;  %2545 = vmatprep.subr.mxu1 %v2498_v10 }
  0x4a   :  { %2423 = vmatmul.mubr.f32.vlgmr.msra.gmra.mxu1 %v3931_v49  ;;  %2624 = vmatprep.subr.mxu0 %v2495_v63 }
  0x4b   :  { %2505 = vmatmul.mubr.f32.vlgmr.msra.gmra.mxu0 %v2504_v13  ;;  %2551 = vmatpush1.xpose.msra.mxu1 %v2504_v13 }
  0x4c   :  { %2627 = vmatpush1.xpose.msra.mxu0 %v2501_v2  ;;  %2585 = vmatprep.mubr.f32.mxu1 %v3948_v59 }
  0x4d   :  { %2662 = vmatprep.mubr.f32.mxu0 %v2495_v63  ;;  %2701 = vmatprep.subr.mxu1 %v3948_v59 }
  0x4e   :  { %2587 = vmatmul.mubr.f32.vlgmr.msra.gmra.mxu1 %v3952_v61  ;;  %2781 = vmatprep.subr.mxu0 %v2496_v3 }
  0x4f   :  { %2665 = vmatmul.mubr.f32.vlgmr.msra.gmra.mxu0 %v2501_v2  ;;  %2703 = vmatpush1.xpose.msra.mxu1 %v3952_v61 }
  0x50   :  { %2785 = vmatpush1.xpose.msra.mxu0 %v2502_v5  ;;  %2739 = vmatprep.mubr.f32.mxu1 %v2496_v3 }
  0x51   :  { %2819 = vmatprep.mubr.f32.mxu0 %v3948_v59  ;;  %2857 = vmatprep.subr.mxu1 %v3948_v59 }
  0x52   :  { %2743 = vmatmul.mubr.f32.vlgmr.msra.gmra.mxu1 %v2502_v5  ;;  %2931 = vmatprep.subr.mxu0 %v3969_v7 }
  0x53   :  { %2821 = vmatmul.mubr.f32.vlgmr.msra.gmra.mxu0 %v3952_v61  ;;  %2859 = vmatpush1.xpose.msra.mxu1 %v3952_v61 }
  0x54   :  { %2933 = vmatpush1.xpose.msra.mxu0 %v3973_v9  ;;  %2893 = vmatprep.mubr.f32.mxu1 %v3948_v59 }
  0x55   :  { %2971 = vmatprep.mubr.f32.mxu0 %v2970_v22  ;;  %3017 = vmatprep.subr.mxu1 %v2970_v22 }
  0x56   :  { %2895 = vmatmul.mubr.f32.vlgmr.msra.gmra.mxu1 %v3952_v61  ;;  %3096 = vmatprep.subr.mxu0 %v2967_v11 }
  0x57   :  { %2977 = vmatmul.mubr.f32.vlgmr.msra.gmra.mxu0 %v2976_v24  ;;  %3023 = vmatpush1.xpose.msra.mxu1 %v2976_v24 }
  0x58   :  { %3099 = vmatpush1.xpose.msra.mxu0 %v2973_v14  ;;  %3057 = vmatprep.mubr.f32.mxu1 %v3969_v7 }
  0x59   :  { %3134 = vmatprep.mubr.f32.mxu0 %v2967_v11  ;;  %3173 = vmatprep.subr.mxu1 %v3969_v7 }
  0x5a   :  { %3059 = vmatmul.mubr.f32.vlgmr.msra.gmra.mxu1 %v3973_v9  ;;  %3253 = vmatprep.subr.mxu0 %v2968_v15 }
  0x5b   :  { %3137 = vmatmul.mubr.f32.vlgmr.msra.gmra.mxu0 %v2973_v14  ;;  %3175 = vmatpush1.xpose.msra.mxu1 %v3973_v9 }
  0x5c   :  { %3257 = vmatpush1.xpose.msra.mxu0 %v2974_v17  ;;  %3211 = vmatprep.mubr.f32.mxu1 %v2968_v15 }
  0x5d   :  { %3291 = vmatprep.mubr.f32.mxu0 %v3969_v7  ;;  %3329 = vmatprep.subr.mxu1 %v3969_v7 }
  0x5e   :  { %3215 = vmatmul.mubr.f32.vlgmr.msra.gmra.mxu1 %v2974_v17  ;;  %3403 = vmatprep.subr.mxu0 %v3990_v19 }
  0x5f   :  { %3293 = vmatmul.mubr.f32.vlgmr.msra.gmra.mxu0 %v3973_v9  ;;  %3331 = vmatpush1.xpose.msra.mxu1 %v3973_v9 }
  0x60   :  { %3405 = vmatpush1.xpose.msra.mxu0 %v3994_v21  ;;  %3365 = vmatprep.mubr.f32.mxu1 %v3969_v7 }
  0x61   :  { %3443 = vmatprep.mubr.f32.mxu0 %v3442_v30  ;;  %3489 = vmatprep.subr.mxu1 %v3442_v30 }
  0x62   :  { %3367 = vmatmul.mubr.f32.vlgmr.msra.gmra.mxu1 %v3973_v9  ;;  %3568 = vmatprep.subr.mxu0 %v3439_v23 }
  0x63   :  { %3449 = vmatmul.mubr.f32.vlgmr.msra.gmra.mxu0 %v3448_v31  ;;  %3495 = vmatpush1.xpose.msra.mxu1 %v3448_v31 }
  0x64   :  { %3571 = vmatpush1.xpose.msra.mxu0 %v3445_v25  ;;  %3529 = vmatprep.mubr.f32.mxu1 %v3990_v19 }
  0x65   :  { %3606 = vmatprep.mubr.f32.mxu0 %v3439_v23  ;;  %3645 = vmatprep.subr.mxu1 %v3990_v19 }
  0x66   :  { %3531 = vmatmul.mubr.f32.vlgmr.msra.gmra.mxu1 %v3994_v21  ;;  %3725 = vmatprep.subr.mxu0 %v3440_v26 }
  0x67   :  { %3609 = vmatmul.mubr.f32.vlgmr.msra.gmra.mxu0 %v3445_v25  ;;  %3647 = vmatpush1.xpose.msra.mxu1 %v3994_v21 }
  0x68   :  { %3729 = vmatpush1.xpose.msra.mxu0 %v3446_v27  ;;  %3683 = vmatprep.mubr.f32.mxu1 %v3440_v26 }
  0x69   :  { %3763 = vmatprep.mubr.f32.mxu0 %v3990_v19  ;;  %3801 = vmatprep.subr.mxu1 %v3990_v19 }
  0x6a   :  { %3687 = vmatmul.mubr.f32.vlgmr.msra.gmra.mxu1 %v3446_v27 }
  0x6b   :  { %3765 = vmatmul.mubr.f32.vlgmr.msra.gmra.mxu0 %v3994_v21  ;;  %3803 = vmatpush1.xpose.msra.mxu1 %v3994_v21 }
  0x6c   :  { %3837 = vmatprep.mubr.f32.mxu1 %v3990_v19 }
  0x6e   :  { %3839 = vmatmul.mubr.f32.vlgmr.msra.gmra.mxu1 %v3994_v21 }
  0xcf   :  { %v146_v33 = vpop.f32.mrf.mxu0 }
  0xd1   :  { %v148_v34 = vpop.f32.mrf.mxu0 }
  0xd2   :  { %v228_v35 = vpop.f32.mrf.mxu1 }
  0xd3   :  { %v229_v36 = vadd.f32 %v228_v35, %v146_v33  ;;  %v306_v37 = vpop.f32.mrf.mxu0 }
  0xd4   :  { %v230_v38 = vpop.f32.mrf.mxu1 }
  0xd5   :  { %v307_v39 = vadd.f32 %v306_v37, %v229_v36  ;;  %v308_v40 = vpop.f32.mrf.mxu0 }
  0xd6   :  { %v384_v41 = vpop.f32.mrf.mxu1 }
  0xd7   :  { %v385_v42 = vadd.f32 %v384_v41, %v307_v39  ;;  %v462_v43 = vpop.f32.mrf.mxu0 }
  0xd8   :  { %v386_v44 = vpop.f32.mrf.mxu1 }
  0xd9   :  { %v463_v45 = vadd.f32 %v462_v43, %v385_v42  ;;  %v464_v46 = vpop.f32.mrf.mxu0 }
  0xda   :  { %v536_v47 = vpop.f32.mrf.mxu1 }
  0xdb   :  { %v537_v48 = vadd.f32 %v536_v47, %v463_v45  ;;  %v618_v49 = vpop.f32.mrf.mxu0 }
  0xdc   :  { %v538_v50 = vpop.f32.mrf.mxu1 }
  0xdd   :  { %v619_v51 = vadd.f32 %v618_v49, %v537_v48  ;;  %v620_v52 = vpop.f32.mrf.mxu0 }
  0xde   :  { %v700_v53 = vpop.f32.mrf.mxu1 }
  0xdf   :  { %v701_v54 = vadd.f32 %v700_v53, %v619_v51  ;;  %v778_v55 = vpop.f32.mrf.mxu0 }
  0xe0   :  { %v702_v56 = vpop.f32.mrf.mxu1 }
  0xe1   :  { %v779_v57 = vadd.f32 %v778_v55, %v701_v54  ;;  %v780_v58 = vpop.f32.mrf.mxu0 }
  0xe2   :  { %v856_v59 = vpop.f32.mrf.mxu1 }
  0xe3   :  { %v857_v60 = vadd.f32 %v856_v59, %v779_v57  ;;  %v934_v61 = vpop.f32.mrf.mxu0 }
  0xe4   :  { %v858_v62 = vpop.f32.mrf.mxu1 }
  0xe5   :  { %v935_v63 = vadd.f32 %v934_v61, %v857_v60  ;;  %v936_v0 = vpop.f32.mrf.mxu0 }
  0xe6   :  { %v1008_v1 = vpop.f32.mrf.mxu1 }
  0xe7   :  { %v1009_v2 = vadd.f32 %v1008_v1, %v935_v63  ;;  %v1090_v3 = vpop.f32.mrf.mxu0 }
  0xe8   :  { %v1010_v4 = vpop.f32.mrf.mxu1 }
  0xe9   :  { %v1091_v5 = vadd.f32 %v1090_v3, %v1009_v2  ;;  %v1092_v6 = vpop.f32.mrf.mxu0 }
  0xea   :  { %v1172_v7 = vpop.f32.mrf.mxu1 }
  0xeb   :  { %v1173_v8 = vadd.f32 %v1172_v7, %v1091_v5  ;;  %v1250_v9 = vpop.f32.mrf.mxu0 }
  0xec   :  { %v1174_v10 = vpop.f32.mrf.mxu1 }
  0xed   :  { %v1251_v11 = vadd.f32 %v1250_v9, %v1173_v8  ;;  %v1252_v12 = vpop.f32.mrf.mxu0 }
  0xee   :  { %v1328_v13 = vpop.f32.mrf.mxu1 }
  0xef   :  { %v1329_v14 = vadd.f32 %v1328_v13, %v1251_v11  ;;  %v1406_v15 = vpop.f32.mrf.mxu0 }
  0xf0   :  { %v1330_v16 = vpop.f32.mrf.mxu1 }
  0xf1   :  { %v1407_v17 = vadd.f32 %v1406_v15, %v1329_v14  ;;  %v1408_v18 = vpop.f32.mrf.mxu0 }
  0xf2   :  { %v1480_v19 = vpop.f32.mrf.mxu1 }
  0xf3   :  { %v1481_v20 = vadd.f32 %v1480_v19, %v1407_v17  ;;  %v1562_v21 = vpop.f32.mrf.mxu0 }
  0xf4   :  { %v1482_v22 = vpop.f32.mrf.mxu1 }
  0xf5   :  { %v1563_v23 = vadd.f32 %v1562_v21, %v1481_v20  ;;  %v1564_v24 = vpop.f32.mrf.mxu0 }
  0xf6   :  { %v1644_v25 = vpop.f32.mrf.mxu1 }
  0xf7   :  { %v1645_v26 = vadd.f32 %v1644_v25, %v1563_v23  ;;  %v1722_v27 = vpop.f32.mrf.mxu0 }
  0xf8   :  { %v1646_v28 = vpop.f32.mrf.mxu1 }
  0xf9   :  { %v1723_v29 = vadd.f32 %v1722_v27, %v1645_v26  ;;  %v1724_v30 = vpop.f32.mrf.mxu0 }
  0xfa   :  { %v1800_v31 = vpop.f32.mrf.mxu1 }
  0xfb   :  { %v1801_v32 = vadd.f32 %v1800_v31, %v1723_v29  ;;  %v1878_v33 = vpop.f32.mrf.mxu0 }
  0xfc   :  { %v1802_v34 = vpop.f32.mrf.mxu1 }
  0xfd   :  { %v1879_v35 = vadd.f32 %v1878_v33, %v1801_v32  ;;  %v1880_v36 = vpop.f32.mrf.mxu0 }
  0xfe   :  { %v1952_v37 = vpop.f32.mrf.mxu1 }
  0xff   :  { %v1953_v38 = vadd.f32 %v1952_v37, %v1879_v35  ;;  %v2034_v39 = vpop.f32.mrf.mxu0 }
 0x100   :  { %v1954_v40 = vpop.f32.mrf.mxu1 }
 0x101   :  { %v2035_v41 = vadd.f32 %v2034_v39, %v1953_v38  ;;  %v2036_v42 = vpop.f32.mrf.mxu0 }
 0x102   :  { %v2116_v43 = vpop.f32.mrf.mxu1 }
 0x103   :  { %v2117_v44 = vadd.f32 %v2116_v43, %v2035_v41  ;;  %v2194_v45 = vpop.f32.mrf.mxu0 }
 0x104   :  { %v2118_v46 = vpop.f32.mrf.mxu1 }
 0x105   :  { %v2195_v47 = vadd.f32 %v2194_v45, %v2117_v44  ;;  %v2196_v48 = vpop.f32.mrf.mxu0  ;;  %v3844_v46 = vld [vmem:[%s4040_s1] sm:$0xf] }
 0x106   :  { %v2272_v49 = vpop.f32.mrf.mxu1 }
 0x107   :  { %v2273_v50 = vadd.f32 %v2272_v49, %v2195_v47  ;;  %v2350_v51 = vpop.f32.mrf.mxu0 }
 0x108   :  { %v2274_v52 = vpop.f32.mrf.mxu1 }
 0x109   :  { %v2351_v53 = vadd.f32 %v2350_v51, %v2273_v50  ;;  %v2352_v54 = vpop.f32.mrf.mxu0 }
 0x10a   :  { %v2424_v55 = vpop.f32.mrf.mxu1 }
 0x10b   :  { %v2425_v56 = vadd.f32 %v2424_v55, %v2351_v53  ;;  %v2506_v57 = vpop.f32.mrf.mxu0 }
 0x10c   :  { %v2426_v58 = vpop.f32.mrf.mxu1 }
 0x10d   :  { %v2507_v59 = vadd.f32 %v2506_v57, %v2425_v56  ;;  %v2508_v60 = vpop.f32.mrf.mxu0 }
 0x10e   :  { %v2588_v61 = vpop.f32.mrf.mxu1 }
 0x10f   :  { %v2589_v62 = vadd.f32 %v2588_v61, %v2507_v59  ;;  %v2666_v63 = vpop.f32.mrf.mxu0 }
 0x110   :  { %v2590_v0 = vpop.f32.mrf.mxu1 }
 0x111   :  { %v2667_v1 = vadd.f32 %v2666_v63, %v2589_v62  ;;  %v2668_v2 = vpop.f32.mrf.mxu0 }
 0x112   :  { %v2744_v3 = vpop.f32.mrf.mxu1 }
 0x113   :  { %v2745_v4 = vadd.f32 %v2744_v3, %v2667_v1  ;;  %v2822_v5 = vpop.f32.mrf.mxu0 }
 0x114   :  { %v2746_v6 = vpop.f32.mrf.mxu1 }
 0x115   :  { %v2823_v7 = vadd.f32 %v2822_v5, %v2745_v4  ;;  %v2824_v8 = vpop.f32.mrf.mxu0 }
 0x116   :  { %v2896_v9 = vpop.f32.mrf.mxu1 }
 0x117   :  { %v2897_v10 = vadd.f32 %v2896_v9, %v2823_v7  ;;  %v2978_v11 = vpop.f32.mrf.mxu0 }
 0x118   :  { %v2898_v12 = vpop.f32.mrf.mxu1 }
 0x119   :  { %v2979_v13 = vadd.f32 %v2978_v11, %v2897_v10  ;;  %v2980_v14 = vpop.f32.mrf.mxu0 }
 0x11a   :  { %v3060_v15 = vpop.f32.mrf.mxu1 }
 0x11b   :  { %v3061_v16 = vadd.f32 %v3060_v15, %v2979_v13  ;;  %v3138_v17 = vpop.f32.mrf.mxu0 }
 0x11c   :  { %v3062_v18 = vpop.f32.mrf.mxu1 }
 0x11d   :  { %v3139_v19 = vadd.f32 %v3138_v17, %v3061_v16  ;;  %v3140_v20 = vpop.f32.mrf.mxu0 }
 0x11e   :  { %v3216_v21 = vpop.f32.mrf.mxu1 }
 0x11f   :  { %v3217_v22 = vadd.f32 %v3216_v21, %v3139_v19  ;;  %v3294_v23 = vpop.f32.mrf.mxu0 }
 0x120   :  { %v3218_v24 = vpop.f32.mrf.mxu1 }
 0x121   :  { %v3295_v25 = vadd.f32 %v3294_v23, %v3217_v22  ;;  %v3296_v26 = vpop.f32.mrf.mxu0 }
 0x122   :  { %v3368_v27 = vpop.f32.mrf.mxu1 }
 0x123   :  { %v3369_v28 = vadd.f32 %v3368_v27, %v3295_v25  ;;  %v3450_v29 = vpop.f32.mrf.mxu0 }
 0x124   :  { %v3370_v30 = vpop.f32.mrf.mxu1 }
 0x125   :  { %v3451_v31 = vadd.f32 %v3450_v29, %v3369_v28  ;;  %v3452_v32 = vpop.f32.mrf.mxu0 }
 0x126   :  { %v3532_v33 = vpop.f32.mrf.mxu1 }
 0x127   :  { %v3533_v34 = vadd.f32 %v3532_v33, %v3451_v31  ;;  %v3610_v35 = vpop.f32.mrf.mxu0 }
 0x128   :  { %v3534_v36 = vpop.f32.mrf.mxu1 }
 0x129   :  { %v3611_v37 = vadd.f32 %v3610_v35, %v3533_v34  ;;  %v3612_v38 = vpop.f32.mrf.mxu0 }
 0x12a   :  { %v3688_v39 = vpop.f32.mrf.mxu1 }
 0x12b   :  { %v3689_v40 = vadd.f32 %v3688_v39, %v3611_v37  ;;  %v3766_v41 = vpop.f32.mrf.mxu0 }
 0x12c   :  { %v3690_v42 = vpop.f32.mrf.mxu1 }
 0x12d   :  { %v3767_v43 = vadd.f32 %v3766_v41, %v3689_v40  ;;  %v3768_v44 = vpop.f32.mrf.mxu0 }
 0x12e   :  { %v3840_v45 = vpop.f32.mrf.mxu1 }
 0x12f   :  { %v3841_v47 = vadd.f32 %v3840_v45, %v3767_v43 }
 0x130   :  { %v3842_v48 = vpop.f32.mrf.mxu1 }
 0x131   :  { %v3845_v49 = vadd.f32 %v3844_v46, %v3841_v47 }
 0x133   :  { %3847 = vst.msk [vmem:[%s4040_s1] sm:$0xf] %vm34_vm0, %v3845_v49 }

</bundles_post_ra>
